<compile_context>
chip_gen: v7x
topology: tpu7x:2x2x1
jax: 0.10.0
libtpu: 0.0.40
codegen_flags: <defaults>
</compile_context>

<pallas_src>
import jax
import jax.numpy as jnp
from jax import lax
from jax.experimental import pallas as pl
from jax.experimental.pallas import tpu as pltpu

NUM_CLASSES = 5


def _linear_sigmoid(x, w, b):
    # logits = x @ W^T + b : contract dim 1 of x (B,D) with dim 1 of w (C,D).
    z = lax.dot_general(
        x, w,
        dimension_numbers=(((1,), (1,)), ((), ())),
        preferred_element_type=jnp.float32,
    )
    z = z + b                               # (B, C) + (1, C) broadcast
    return 1.0 / (1.0 + jnp.exp(-z))        # sigmoid (exp goes to the EUP slot)


# ---------------------------------------------------------------------------
# Inference kernel: y_pred = sigmoid(x @ W^T + b)
# ---------------------------------------------------------------------------
def _fwd_kernel(x_ref, w_ref, b_ref, o_ref):
    o_ref[...] = _linear_sigmoid(x_ref[...], w_ref[...], b_ref[...])


# ---------------------------------------------------------------------------
# Fused training kernel: loss = CrossEntropyLoss(sigmoid(x @ W^T + b), y)
# PyTorch's CrossEntropyLoss applies log_softmax to its first argument (here
# the *sigmoid* output, exactly as the original module does) and takes the
# mean NLL over the batch.
# ---------------------------------------------------------------------------
def _fused_loss_kernel(x_ref, w_ref, b_ref, y_ref, loss_ref):
    p = _linear_sigmoid(x_ref[...], w_ref[...], b_ref[...])             # (B, C)
    # max-stabilized log-sum-exp over classes
    m = jnp.max(p, axis=-1, keepdims=True)                               # (B, 1)
    lse = m + jnp.log(jnp.sum(jnp.exp(p - m), axis=-1, keepdims=True))   # (B, 1)
    # in-kernel one-hot: class iota compared against int32 targets (B, 1)
    cls = lax.broadcasted_iota(jnp.int32, p.shape, 1)                    # (B, C)
    tgt = jnp.sum(jnp.where(cls == y_ref[...], p, 0.0), axis=-1, keepdims=True)
    # NOTE: the 1/B mean is only valid while the whole batch is one block;
    # if the batch is ever tiled over a grid axis, switch to a pl.when
    # init/finalize accumulator.
    loss_ref[0, 0] = jnp.sum(lse - tgt) * (1.0 / p.shape[0])


# ---------------------------------------------------------------------------
# TorchModel equivalent (each path dispatched as one jit'd executable)
# ---------------------------------------------------------------------------
_VMEM = pl.BlockSpec(memory_space=pltpu.MemorySpace.VMEM)
_SMEM = pl.BlockSpec(memory_space=pltpu.MemorySpace.SMEM)


@jax.jit
def predict(params, x):
    B = x.shape[0]
    C = params["w"].shape[0]
    # At these tiny shapes a single no-grid call is optimal; for large B,
    # tile the batch with grid=(cdiv(B,TB),) and dimension_semantics=("parallel",).
    return pl.pallas_call(
        _fwd_kernel,
        out_shape=jax.ShapeDtypeStruct((B, C), jnp.float32),
        in_specs=[_VMEM, _VMEM, _VMEM],
        out_specs=_VMEM,
    )(x, params["w"], params["b"].reshape(1, C))


@jax.jit
def loss_fn(params, x, y):
    B = x.shape[0]
    C = params["w"].shape[0]
    out = pl.pallas_call(
        _fused_loss_kernel,
        out_shape=jax.ShapeDtypeStruct((1, 1), jnp.float32),
        in_specs=[_VMEM, _VMEM, _VMEM, _VMEM],
        out_specs=_SMEM,
    )(x, params["w"], params["b"].reshape(1, C),
      y.reshape(B, 1).astype(jnp.int32))
    return out[0, 0]


def torch_model_forward(params, x, y=None):
    if y is not None:
        return loss_fn(params, x, y)
    return predict(params, x)


def init_params(key, input_size, num_classes=NUM_CLASSES):
    # Deterministic init mimicking nn.Linear's U(-1/sqrt(in), 1/sqrt(in)).
    kw, kb = jax.random.split(key)
    bound = 1.0 / jnp.sqrt(jnp.float32(input_size))
    w = jax.random.uniform(kw, (num_classes, input_size), jnp.float32, -bound, bound)
    b = jax.random.uniform(kb, (num_classes,), jnp.float32, -bound, bound)
    return {"w": w, "b": b}


if __name__ == "__main__":
    key = jax.random.PRNGKey(0)
    k_param, k_x, k_y = jax.random.split(key, 3)

    batch, input_size = 8, 32
    params = init_params(k_param, input_size)
    x = jax.random.normal(k_x, (batch, input_size), jnp.float32)
    y = jax.random.randint(k_y, (batch,), 0, NUM_CLASSES, jnp.int32)

    # Inference path: sigmoid(linear(x))
    y_pred = torch_model_forward(params, x)
    jax.block_until_ready(y_pred)

    # Training path: CrossEntropyLoss(sigmoid(linear(x)), y) — single fused kernel
    loss_val = torch_model_forward(params, x, y)
    jax.block_until_ready(loss_val)

    # Sanity check against plain-JAX reference.
    ref_pred = jax.nn.sigmoid(x @ params["w"].T + params["b"])
    ref_loss = jnp.mean(
        jax.nn.logsumexp(ref_pred, axis=1)
        - ref_pred[jnp.arange(batch), y]
    )
    assert jnp.allclose(y_pred, ref_pred, atol=1e-5), "y_pred mismatch"
    assert jnp.allclose(loss_val, ref_loss, atol=1e-5), "loss mismatch"

    print("KERNEL_OK")
</pallas_src>

<mosaic_0001>
module attributes {stable_mosaic.version = 11 : i64} {
  func.func @_fwd_kernel(%arg0: memref<8x32xf32, #tpu.memory_space<vmem>>, %arg1: memref<5x32xf32, #tpu.memory_space<vmem>>, %arg2: memref<1x5xf32, #tpu.memory_space<vmem>>, %arg3: memref<8x5xf32, #tpu.memory_space<vmem>>) attributes {dimension_semantics = [], scalar_prefetch = 0 : i64, scratch_operands = 0 : i64, tpu.core_type = #tpu.core_type<tc>} {
    %c0 = arith.constant 0 : index
    %c0_0 = arith.constant 0 : index
    %0 = vector.load %arg0[%c0, %c0_0] : memref<8x32xf32, #tpu.memory_space<vmem>>, vector<8x32xf32>
    %c0_1 = arith.constant 0 : index
    %c0_2 = arith.constant 0 : index
    %1 = vector.load %arg1[%c0_1, %c0_2] : memref<5x32xf32, #tpu.memory_space<vmem>>, vector<5x32xf32>
    %c0_3 = arith.constant 0 : index
    %c0_4 = arith.constant 0 : index
    %2 = vector.load %arg2[%c0_3, %c0_4] : memref<1x5xf32, #tpu.memory_space<vmem>>, vector<1x5xf32>
    %cst = arith.constant dense<0.000000e+00> : vector<8x5xf32>
    %3 = tpu.matmul %0, %1, %cst {dimension_numbers = #tpu.dot_dimension_numbers<[1], [1], [0], [0], [0, 0, 1, 0], [], []>} : vector<8x32xf32>, vector<5x32xf32>, vector<8x5xf32> -> vector<8x5xf32>
    %4 = vector.broadcast %2 : vector<1x5xf32> to vector<8x5xf32>
    %5 = arith.addf %3, %4 : vector<8x5xf32>
    %cst_5 = arith.constant 0.000000e+00 : f32
    %6 = vector.broadcast %cst_5 : f32 to vector<8x5xf32>
    %7 = arith.subf %6, %5 : vector<8x5xf32>
    %8 = math.exp %7 : vector<8x5xf32>
    %cst_6 = arith.constant 1.000000e+00 : f32
    %9 = vector.broadcast %cst_6 : f32 to vector<8x5xf32>
    %10 = arith.addf %9, %8 : vector<8x5xf32>
    %cst_7 = arith.constant 1.000000e+00 : f32
    %11 = vector.broadcast %cst_7 : f32 to vector<8x5xf32>
    %12 = arith.divf %11, %10 : vector<8x5xf32>
    %c0_8 = arith.constant 0 : index
    %c0_9 = arith.constant 0 : index
    %13 = vector.load %arg3[%c0_8, %c0_9] : memref<8x5xf32, #tpu.memory_space<vmem>>, vector<8x5xf32>
    tpu.vector_store %arg3[%c0_8, %c0_9], %12 {strides = array<i32>} : memref<8x5xf32, #tpu.memory_space<vmem>>, vector<8x5xf32>,
    return
  }
}

</mosaic_0001>

<bundles_post_ra>
// kernel: predict.1
= control target key start
LH: loop header
LB: loop body
LE: loop exit
PB: predicated region body
PF: predicated region fallthrough
CT: control target
= control target key end

     0   :  { %8 = vsyncpa [#allocation3], 0  ;;  %s256_s0 = inlined_call_operand.vmem [shape: f32[8,32], index: 0, kind: input, shape index: {}]   ;;  %s257_s1 = inlined_call_operand.hbm [shape: f32[5,32], index: 1, kind: input, shape index: {}]   ;;  %s258_s2 = inlined_call_operand.vmem [shape: f32[1,5], index: 2, kind: input, shape index: {}]   ;;  %s259_s3 = inlined_call_operand.hbm [shape: f32[8,5], index: 3, kind: output, shape index: {}]  }
   0x1   :  { %9 = vsyncpa [#allocation4], 0  ;;  %s202_s12 = smov [#allocation2]   ;;  %s154_s16 = scalar_lea.hbm %s257_s1, 128 }
   0x2   :  { %s18_s13 = sshll.u32 %s202_s12, 4  ;;  %p155_p0 = scmp.ne.s32.totalorder %s257_s1, %s154_s16  ;;  %s19_s13 = int_to_ptr.vmem [resolvable:$true] %s18_s13 }
   0x3   :  { %p158_p1 = scmp.lt.u32.totalorder %s154_s16, %s257_s1 }
   0x5   :  { %p160_p2 = pnand %p158_p1, %p155_p0 }
   0x7   :  { %163 = shalt.err (!%p160_p2)
}
   0x8   :  { %s164_s21 = scalar_lea.vmem %s19_s13, 128  ;;  %p169_p4 = scmp.lt.s32.totalorder %s19_s13, %s19_s13 }
   0x9   :  { %p165_p3 = scmp.ne.s32.totalorder %s19_s13, %s164_s21  ;;  %p170_p5 = scmp.lt.s32.totalorder %s164_s21, %s164_s21 }
   0xb   :  { %p171_p6 = por %p170_p5, %p169_p4 }
   0xd   :  { %p172_p7 = pnand %p171_p6, %p165_p3 }
   0xf   :  { %175 = shalt.err (!%p172_p7)
}
  0x10   :  { %21 = dma.hbm_to_vmem [thread:$0]  %s257_s1, 128, %s19_s13, [#allocation3]  }
  0x11   :  { %198 = dma.done.wait [#allocation3], 128  }
  0x12   :  { %199 = vsyncadd [#allocation3], 4294967168  ;;  %v203_v0 = vmov 0.0   ;;  %vm204_vm0 = vmmov 0   ;;  %vm36_vm1 = vcmask 261120   ;;  %v27_v2 = vld [vmem:[%s256_s0] sm:$0xff] }
  0x13   :  { %141 = vmatprep.subr.mxu0 %v203_v0  ;;  %143 = vmatprep.mubr.msk.f32.mxu0 %vm204_vm0, %v203_v0  ;;  %v28_v1 = vld [vmem:[#allocation2] sm:$0x1f]  ;;  %s205_s1 = smov [#allocation5]   ;;  %vm119_vm2 = vcmask 39936  }
  0x14   :  { %142 = vmatpush3.xpose.msk.msra.mxu0 %vm36_vm1, %v28_v1  ;;  %v136_v3 = vld [vmem:[%s258_s2] ss:$0 sm:$0xff]  ;;  %s127_s28 = sshll.u32 %s205_s1, 4  ;;  %s128_s28 = int_to_ptr.vmem [resolvable:$true] %s127_s28 }
  0x15   :  { %s176_s0 = scalar_lea.vmem %s128_s28, 128  ;;  %p181_p9 = scmp.lt.s32.totalorder %s128_s28, %s128_s28 }
  0x16   :  { %p177_p8 = scmp.ne.s32.totalorder %s128_s28, %s176_s0  ;;  %p182_p10 = scmp.lt.s32.totalorder %s176_s0, %s176_s0 }
  0x17   :  { %144 = vmatmul.mubr.msk.f32.vlgmr.msra.gmra.mrb[0].mxu0 %vm36_vm1, %v27_v2 }
  0x18   :  { %p183_p11 = por %p182_p10, %p181_p9 }
  0x1a   :  { %p184_p12 = pnand %p183_p11, %p177_p8 }
  0xea   :  { %v109_v4 = vpop.f32.mrb[0].mxu0 }
  0xeb   :  { %v110_v5 = vadd.f32 %v136_v3, %v109_v4  ;;  %v145_v6 = vpop.f32.mrb[1].mxu0 }
  0xed   :  { %v113_v7 = vsub.f32 0.0, %v110_v5 }
  0xef   :  { %v114_v8 = vmul.f32 1.442695, %v113_v7 }
  0xf1   :  { %150 = vpow2.f32 %v114_v8 }
  0xfb   :  { %v151_v9 = vpop.eup %150 }
  0xfc   :  { %v116_v10 = vadd.f32 1.0, %v151_v9 }
  0xfe   :  { %152 = vrcp.f32 %v116_v10 }
 0x108   :  { %v153_v11 = vpop.eup %152 }
 0x109   :  { %120 = vst.msk [vmem:[#allocation5] sm:$0xff] %vm119_vm2, %v153_v11 }
 0x10a   :  { %187 = shalt.err (!%p184_p12)
}
 0x10b   :  { %s188_s30 = scalar_lea.hbm %s259_s3, 128 }
 0x10c   :  { %p189_p13 = scmp.ne.s32.totalorder %s259_s3, %s188_s30  ;;  %p192_p0 = scmp.lt.u32.totalorder %s188_s30, %s259_s3 }
 0x10e   :  { %p194_p1 = pnand %p192_p0, %p189_p13 }
 0x110   :  { %197 = shalt.err (!%p194_p1)
}
 0x111   :  { %130 = dma.vmem_to_hbm [thread:$0]  %s128_s28, 128, %s259_s3, [#allocation4]  }
 0x112   :  { %200 = dma.done.wait [#allocation4], 128  }
 0x113   :  { %201 = vsyncadd [#allocation4], 4294967168 }
 0x114   :  { %134 = vsyncpa [#allocation3], 1 }
 0x115   :  { %135 = vsyncpa [#allocation4], 1 }

</bundles_post_ra>
